<compile_context>
chip_gen: v6e
topology: v6e:2x2x1
jax: 0.10.0
libtpu: 0.0.40
codegen_flags: <defaults>
</compile_context>

<pallas_src>
import functools

import jax
import jax.numpy as jnp
from jax import lax
from jax.experimental import pallas as pl
from jax.experimental.pallas import tpu as pltpu


def _round_up(x, m):
    return ((x + m - 1) // m) * m


def _cast(x, dtype):
    return x if x.dtype == dtype else x.astype(dtype)


def _default_lane():
    # 256-wide MXU on v6e / v7x; 128 on v5e and as a safe fallback.
    try:
        kind = jax.devices()[0].device_kind.lower()
    except Exception:
        return 128
    return 256 if ("v6" in kind or "v7" in kind or "7x" in kind) else 128


def _memory_network_kernel(q_ref, w_ref, b_ref, mem_ref, out_ref,
                           qproj_sc, m_sc, l_sc, acc_sc, *,
                           matmul_dtype, m_real, m_block, m_total,
                           approx_reciprocal):
    j = pl.program_id(1)

    @pl.when(j == 0)
    def _init():
        # Linear: proj = q @ W^T + b (wrapper passes the weight pre-transposed).
        q = _cast(q_ref[...], matmul_dtype)
        w = _cast(w_ref[...], matmul_dtype)
        proj = jnp.dot(q, w, preferred_element_type=jnp.float32)
        proj = proj + b_ref[...].astype(jnp.float32)
        qproj_sc[...] = proj.astype(qproj_sc.dtype)
        m_sc[...] = jnp.full_like(m_sc, -jnp.inf)
        l_sc[...] = jnp.zeros_like(l_sc)
        acc_sc[...] = jnp.zeros_like(acc_sc)

    mem = _cast(mem_ref[...], matmul_dtype)        # (m_block, E_pad), pre-cast in wrapper
    qp = qproj_sc[...]                             # (bb, E_pad)

    # sim = proj @ mem_block^T : contract last dims of both operands
    # (no explicit in-kernel transpose of the memory tile).
    sim = lax.dot_general(qp, mem,
                          dimension_numbers=(((1,), (1,)), ((), ())),
                          preferred_element_type=jnp.float32)       # (bb, m_block) f32

    if m_total > m_real:
        # Mask zero-padded memory rows out of the softmax.
        col = j * m_block + lax.broadcasted_iota(jnp.int32, sim.shape, 1)
        sim = jnp.where(col < m_real, sim, -1e30)

    # Online softmax over the memory axis, f32 on VPU/EUP.
    m_prev = m_sc[...]
    m_new = jnp.maximum(m_prev, jnp.max(sim, axis=-1, keepdims=True))
    alpha = jnp.exp(m_prev - m_new)
    p = jnp.exp(sim - m_new)
    l_sc[...] = alpha * l_sc[...] + jnp.sum(p, axis=-1, keepdims=True)
    acc_sc[...] = alpha * acc_sc[...] + jnp.dot(
        p.astype(matmul_dtype), mem, preferred_element_type=jnp.float32)
    m_sc[...] = m_new

    @pl.when(j == pl.num_programs(1) - 1)
    def _finalize():
        out = acc_sc[...] * pl.reciprocal(l_sc[...], approx=approx_reciprocal)
        out_ref[...] = out.astype(out_ref.dtype)


def prepare_memory_network_params(w_t, bias, memory, *,
                                  matmul_dtype=jnp.bfloat16,
                                  lane=None, m_block=512):
    """Pad + cast the parameters ONCE (call at init time, not per forward).

    w_t: (2H, E) transposed Linear weight; bias: (E,); memory: (M, E).
    """
    if lane is None:
        lane = _default_lane()
    F, E = w_t.shape
    M, E2 = memory.shape
    assert E2 == E and bias.shape == (E,)

    F_pad = _round_up(F, 128)                 # contraction dim of the projection
    E_pad = _round_up(E, lane)
    m_block = _round_up(m_block, lane)
    M_pad = _round_up(M, lane)
    if M_pad <= m_block:
        m_blk = M_pad                         # single M block
    else:
        m_blk = m_block
        M_pad = _round_up(M_pad, m_blk)

    w_p = jnp.zeros((F_pad, E_pad), matmul_dtype).at[:F, :E].set(
        w_t.astype(matmul_dtype))
    b_p = jnp.zeros((1, E_pad), jnp.float32).at[0, :E].set(
        bias.astype(jnp.float32))
    mem_p = jnp.zeros((M_pad, E_pad), matmul_dtype).at[:M, :E].set(
        memory.astype(matmul_dtype))

    return dict(w=w_p, b=b_p, mem=mem_p,
                F=F, E=E, M=M, m_block=m_blk,
                matmul_dtype=jnp.dtype(matmul_dtype))


def memory_network_forward(params, query, *, block_b=128, approx_reciprocal=None):
    """query: (B, 2H) f32.  Returns (B, E) f32."""
    dt = params["matmul_dtype"]
    if approx_reciprocal is None:
        approx_reciprocal = bool(dt != jnp.float32)
    w_p, b_p, mem_p = params["w"], params["b"], params["mem"]
    F_pad, E_pad = w_p.shape
    M_pad = mem_p.shape[0]
    m_blk = params["m_block"]
    F, E, M = params["F"], params["E"], params["M"]

    B, Fq = query.shape
    assert Fq == F

    # bf16 vregs pack (16, 128); f32 pack (8, 128).
    sublane = 8 * (4 // dt.itemsize)
    block_b = _round_up(block_b, sublane)
    B_sub = _round_up(B, sublane)
    if B_sub > block_b:
        bb = block_b
    elif B_sub % (2 * sublane) == 0:
        bb = B_sub // 2           # >=2 parallel steps (v7x: 2 TCs) without extra padding
    else:
        bb = B_sub
    B_pad = _round_up(B_sub, bb)

    # Only the (small) query is padded / cast per call.
    q_p = jnp.zeros((B_pad, F_pad), dt).at[:B, :F].set(query.astype(dt))

    grid = (B_pad // bb, M_pad // m_blk)
    nb = grid[0]

    kernel = functools.partial(
        _memory_network_kernel,
        matmul_dtype=dt, m_real=M, m_block=m_blk, m_total=M_pad,
        approx_reciprocal=approx_reciprocal)

    # Advisory cost: resident weight/bias DMA'd once; memory re-read per batch block.
    cost = pl.CostEstimate(
        flops=int(2 * B_pad * F_pad * E_pad + 4 * B_pad * M_pad * E_pad),
        transcendentals=int(B_pad * M_pad),
        bytes_accessed=int(q_p.nbytes + w_p.nbytes + b_p.nbytes
                           + nb * mem_p.nbytes + 4 * B_pad * E_pad),
    )

    # Per-step VMEM working set (double-buffered ins/outs + scratch); raise the
    # scoped limit only when the default (32 MiB) would not fit.
    itm = dt.itemsize
    vmem_need = (2 * itm * (bb * F_pad + F_pad * E_pad + m_blk * E_pad)
                 + 2 * 4 * E_pad + 2 * 4 * bb * E_pad
                 + itm * bb * E_pad + 4 * (2 * bb + bb * E_pad))
    vmem_limit = None
    if vmem_need > 32 * 1024 * 1024:
        vmem_limit = min(int(vmem_need * 5 // 4), 64 * 1024 * 1024)

    out = pl.pallas_call(
        kernel,
        out_shape=jax.ShapeDtypeStruct((B_pad, E_pad), jnp.float32),
        grid_spec=pltpu.PrefetchScalarGridSpec(
            num_scalar_prefetch=0,
            grid=grid,
            in_specs=[
                pl.BlockSpec((bb, F_pad), lambda i, j: (i, 0)),      # query block
                pl.BlockSpec((F_pad, E_pad), lambda i, j: (0, 0)),   # weight (resident)
                pl.BlockSpec((1, E_pad), lambda i, j: (0, 0)),       # bias (resident)
                pl.BlockSpec((m_blk, E_pad), lambda i, j: (j, 0)),   # memory block
            ],
            out_specs=pl.BlockSpec((bb, E_pad), lambda i, j: (i, 0)),
            scratch_shapes=[
                pltpu.VMEM((bb, E_pad), dt),            # cached projection
                pltpu.VMEM((bb, 1), jnp.float32),       # running max
                pltpu.VMEM((bb, 1), jnp.float32),       # running denom
                pltpu.VMEM((bb, E_pad), jnp.float32),   # output accumulator
            ],
        ),
        compiler_params=pltpu.CompilerParams(
            dimension_semantics=("parallel", "arbitrary"),
            vmem_limit_bytes=vmem_limit),
        cost_estimate=cost,
    )(q_p, w_p, b_p, mem_p)

    return out[:B, :E]


def memory_network_reference(query, w_t, bias, memory, matmul_dtype=jnp.float32):
    """Pure-JAX reference.  matmul_dtype=f32 == exact PyTorch module semantics."""
    q = query.astype(matmul_dtype)
    w = w_t.astype(matmul_dtype)
    m = memory.astype(matmul_dtype)
    proj = jnp.dot(q, w, preferred_element_type=jnp.float32) + bias.astype(jnp.float32)
    sim = lax.dot_general(proj.astype(matmul_dtype), m,
                          dimension_numbers=(((1,), (1,)), ((), ())),
                          preferred_element_type=jnp.float32)
    attn = jax.nn.softmax(sim, axis=-1)
    return jnp.dot(attn.astype(matmul_dtype), m, preferred_element_type=jnp.float32)


if __name__ == "__main__":
    key = jax.random.PRNGKey(0)

    def make_inputs(k, embedding_dim, memory_size, hidden_dim, batch):
        k_mem, k_w, k_b, k_q = jax.random.split(k, 4)
        memory = jax.random.normal(k_mem, (memory_size, embedding_dim), jnp.float32)
        # nn.Linear(hidden_dim*2, embedding_dim): weight (E, 2H), bias (E,)
        w = jax.random.normal(k_w, (embedding_dim, hidden_dim * 2), jnp.float32) * 0.05
        bias = jax.random.normal(k_b, (embedding_dim,), jnp.float32) * 0.05
        query = jax.random.normal(k_q, (batch, hidden_dim * 2), jnp.float32)
        return query, w.T, bias, memory   # pass W^T so kernel computes x @ W^T

    k_a, k_b_cfg = jax.random.split(key)

    # --- Config A: module-default tiny sizes (single M block, single b block) ---
    query, w_t, bias, memory = make_inputs(k_a, embedding_dim=32, memory_size=16,
                                           hidden_dim=32, batch=8)
    ref_f32 = memory_network_reference(query, w_t, bias, memory)

    # Exact path: f32 MXU matmuls + exact reciprocal — strict check.
    params_f32 = prepare_memory_network_params(w_t, bias, memory,
                                               matmul_dtype=jnp.float32)
    out_f32 = jax.block_until_ready(memory_network_forward(params_f32, query))
    assert out_f32.shape == (8, 32)
    assert jnp.allclose(out_f32, ref_f32, atol=1e-4, rtol=1e-4), "A/f32 mismatch"

    # Perf path (default): bf16 MXU operands + EUP approx reciprocal.
    params_bf16 = prepare_memory_network_params(w_t, bias, memory)
    out_bf16 = jax.block_until_ready(memory_network_forward(params_bf16, query))
    assert out_bf16.shape == (8, 32)
    ref_bf16 = memory_network_reference(query, w_t, bias, memory, jnp.bfloat16)
    assert jnp.allclose(out_bf16, ref_bf16, atol=1e-2, rtol=1e-2), "A/bf16 mismatch"
    assert jnp.allclose(out_bf16, ref_f32, atol=1e-1, rtol=1e-1), "A/bf16 drift"

    # --- Config B: exercises online-softmax M-tiling + 2-step parallel batch ---
    query, w_t, bias, memory = make_inputs(k_b_cfg, embedding_dim=48,
                                           memory_size=300, hidden_dim=40, batch=32)
    ref_f32 = memory_network_reference(query, w_t, bias, memory)

    params_f32 = prepare_memory_network_params(w_t, bias, memory,
                                               matmul_dtype=jnp.float32,
                                               m_block=128)
    out_f32 = jax.block_until_ready(memory_network_forward(params_f32, query))
    assert out_f32.shape == (32, 48)
    assert jnp.allclose(out_f32, ref_f32, atol=2e-3, rtol=2e-3), "B/f32 mismatch"

    params_bf16 = prepare_memory_network_params(w_t, bias, memory, m_block=128)
    out_bf16 = jax.block_until_ready(memory_network_forward(params_bf16, query))
    assert out_bf16.shape == (32, 48)
    ref_bf16 = memory_network_reference(query, w_t, bias, memory, jnp.bfloat16)
    assert jnp.allclose(out_bf16, ref_bf16, atol=3e-2, rtol=3e-2), "B/bf16 mismatch"

    print("KERNEL_OK")
</pallas_src>

<mosaic_0001>
module attributes {stable_mosaic.version = 11 : i64} {
  func.func @_memory_network_kernel(%arg0: i32, %arg1: i32, %arg2: memref<8x128xf32, #tpu.memory_space<vmem>>, %arg3: memref<128x128xf32, #tpu.memory_space<vmem>>, %arg4: memref<1x128xf32, #tpu.memory_space<vmem>>, %arg5: memref<128x128xf32, #tpu.memory_space<vmem>>, %arg6: memref<8x128xf32, #tpu.memory_space<vmem>>, %arg7: memref<8x128xf32, #tpu.memory_space<vmem>>, %arg8: memref<8x1xf32, #tpu.memory_space<vmem>>, %arg9: memref<8x1xf32, #tpu.memory_space<vmem>>, %arg10: memref<8x128xf32, #tpu.memory_space<vmem>>) attributes {dimension_semantics = [#tpu.dimension_semantics<parallel>, #tpu.dimension_semantics<arbitrary>], iteration_bounds = array<i64: 1, 1>, scalar_prefetch = 0 : i64, scratch_operands = 4 : i64, tpu.core_type = #tpu.core_type<tc>, window_params = [{transform_indices = @transform_0, window_bounds = array<i64: 8, 128>}, {pipeline_mode = #tpu.pipeline_mode<synchronous>, transform_indices = @transform_1, window_bounds = array<i64: 128, 128>}, {pipeline_mode = #tpu.pipeline_mode<synchronous>, transform_indices = @transform_2, window_bounds = array<i64: 1, 128>}, {transform_indices = @transform_3, window_bounds = array<i64: 128, 128>}, {transform_indices = @transform_4, window_bounds = array<i64: 8, 128>}]} {
    %c0_i32 = arith.constant 0 : i32
    %0 = arith.cmpi eq, %arg1, %c0_i32 : i32
    %1 = arith.extui %0 : i1 to i32
    %c0_i32_0 = arith.constant 0 : i32
    %2 = arith.cmpi ne, %1, %c0_i32_0 : i32
    scf.if %2 {
      %c0_22 = arith.constant 0 : index
      %c0_23 = arith.constant 0 : index
      %39 = vector.load %arg2[%c0_22, %c0_23] : memref<8x128xf32, #tpu.memory_space<vmem>>, vector<8x128xf32>
      %c0_24 = arith.constant 0 : index
      %c0_25 = arith.constant 0 : index
      %40 = vector.load %arg3[%c0_24, %c0_25] : memref<128x128xf32, #tpu.memory_space<vmem>>, vector<128x128xf32>
      %cst_26 = arith.constant dense<0.000000e+00> : vector<8x128xf32>
      %41 = tpu.matmul %39, %40, %cst_26 {dimension_numbers = #tpu.dot_dimension_numbers<[1], [0], [0], [1], [0, 0, 1, 1], [], []>} : vector<8x128xf32>, vector<128x128xf32>, vector<8x128xf32> -> vector<8x128xf32>
      %c0_27 = arith.constant 0 : index
      %c0_28 = arith.constant 0 : index
      %42 = vector.load %arg4[%c0_27, %c0_28] : memref<1x128xf32, #tpu.memory_space<vmem>>, vector<1x128xf32>
      %43 = vector.broadcast %42 : vector<1x128xf32> to vector<8x128xf32>
      %44 = arith.addf %41, %43 : vector<8x128xf32>
      %c0_29 = arith.constant 0 : index
      %c0_30 = arith.constant 0 : index
      %45 = vector.load %arg7[%c0_29, %c0_30] : memref<8x128xf32, #tpu.memory_space<vmem>>, vector<8x128xf32>
      tpu.vector_store %arg7[%c0_29, %c0_30], %44 {strides = array<i32>} : memref<8x128xf32, #tpu.memory_space<vmem>>, vector<8x128xf32>,
      %cst_31 = arith.constant 0xFF800000 : f32
      %46 = vector.broadcast %cst_31 : f32 to vector<8x1xf32>
      %c0_32 = arith.constant 0 : index
      %c0_33 = arith.constant 0 : index
      %47 = vector.load %arg8[%c0_32, %c0_33] : memref<8x1xf32, #tpu.memory_space<vmem>>, vector<8x1xf32>
      tpu.vector_store %arg8[%c0_32, %c0_33], %46 {strides = array<i32>} : memref<8x1xf32, #tpu.memory_space<vmem>>, vector<8x1xf32>,
      %cst_34 = arith.constant 0.000000e+00 : f32
      %48 = vector.broadcast %cst_34 : f32 to vector<8x1xf32>
      %c0_35 = arith.constant 0 : index
      %c0_36 = arith.constant 0 : index
      %49 = vector.load %arg9[%c0_35, %c0_36] : memref<8x1xf32, #tpu.memory_space<vmem>>, vector<8x1xf32>
      tpu.vector_store %arg9[%c0_35, %c0_36], %48 {strides = array<i32>} : memref<8x1xf32, #tpu.memory_space<vmem>>, vector<8x1xf32>,
      %cst_37 = arith.constant 0.000000e+00 : f32
      %50 = vector.broadcast %cst_37 : f32 to vector<8x128xf32>
      %c0_38 = arith.constant 0 : index
      %c0_39 = arith.constant 0 : index
      %51 = vector.load %arg10[%c0_38, %c0_39] : memref<8x128xf32, #tpu.memory_space<vmem>>, vector<8x128xf32>
      tpu.vector_store %arg10[%c0_38, %c0_39], %50 {strides = array<i32>} : memref<8x128xf32, #tpu.memory_space<vmem>>, vector<8x128xf32>,
    } else {
    }
    %c0 = arith.constant 0 : index
    %c0_1 = arith.constant 0 : index
    %3 = vector.load %arg5[%c0, %c0_1] : memref<128x128xf32, #tpu.memory_space<vmem>>, vector<128x128xf32>
    %c0_2 = arith.constant 0 : index
    %c0_3 = arith.constant 0 : index
    %4 = vector.load %arg7[%c0_2, %c0_3] : memref<8x128xf32, #tpu.memory_space<vmem>>, vector<8x128xf32>
    %cst = arith.constant dense<0.000000e+00> : vector<8x128xf32>
    %5 = tpu.matmul %4, %3, %cst {dimension_numbers = #tpu.dot_dimension_numbers<[1], [1], [0], [0], [0, 0, 1, 0], [], []>} : vector<8x128xf32>, vector<128x128xf32>, vector<8x128xf32> -> vector<8x128xf32>
    %c128_i32 = arith.constant 128 : i32
    %6 = arith.muli %arg1, %c128_i32 : i32
    %7 = tpu.iota {dimensions = array<i32: 1>} : vector<8x128xi32>
    %8 = vector.broadcast %6 : i32 to vector<8x128xi32>
    %9 = arith.addi %8, %7 : vector<8x128xi32>
    %c16_i32 = arith.constant 16 : i32
    %10 = vector.broadcast %c16_i32 : i32 to vector<8x128xi32>
    %11 = arith.cmpi slt, %9, %10 : vector<8x128xi32>
    %cst_4 = arith.constant -1.000000e+30 : f32
    %12 = vector.broadcast %cst_4 : f32 to vector<8x128xf32>
    %13 = arith.select %11, %5, %12 : vector<8x128xi1>, vector<8x128xf32>
    %c0_5 = arith.constant 0 : index
    %c0_6 = arith.constant 0 : index
    %14 = vector.load %arg8[%c0_5, %c0_6] : memref<8x1xf32, #tpu.memory_space<vmem>>, vector<8x1xf32>
    %cst_7 = arith.constant dense<0xFF800000> : vector<8xf32>
    %15 = vector.multi_reduction <maximumf>, %13, %cst_7 [1] : vector<8x128xf32> to vector<8xf32>
    %16 = vector.shape_cast %15 : vector<8xf32> to vector<8x1xf32>
    %17 = arith.maximumf %14, %16 : vector<8x1xf32>
    %18 = arith.subf %14, %17 : vector<8x1xf32>
    %19 = math.exp %18 : vector<8x1xf32>
    %20 = vector.broadcast %17 : vector<8x1xf32> to vector<8x128xf32>
    %21 = arith.subf %13, %20 : vector<8x128xf32>
    %22 = math.exp %21 : vector<8x128xf32>
    %c0_8 = arith.constant 0 : index
    %c0_9 = arith.constant 0 : index
    %23 = vector.load %arg9[%c0_8, %c0_9] : memref<8x1xf32, #tpu.memory_space<vmem>>, vector<8x1xf32>
    %24 = arith.mulf %19, %23 : vector<8x1xf32>
    %cst_10 = arith.constant dense<0.000000e+00> : vector<8xf32>
    %25 = vector.multi_reduction <add>, %22, %cst_10 [1] : vector<8x128xf32> to vector<8xf32>
    %26 = vector.shape_cast %25 : vector<8xf32> to vector<8x1xf32>
    %27 = arith.addf %24, %26 : vector<8x1xf32>
    %c0_11 = arith.constant 0 : index
    %c0_12 = arith.constant 0 : index
    %28 = vector.load %arg9[%c0_11, %c0_12] : memref<8x1xf32, #tpu.memory_space<vmem>>, vector<8x1xf32>
    tpu.vector_store %arg9[%c0_11, %c0_12], %27 {strides = array<i32>} : memref<8x1xf32, #tpu.memory_space<vmem>>, vector<8x1xf32>,
    %c0_13 = arith.constant 0 : index
    %c0_14 = arith.constant 0 : index
    %29 = vector.load %arg10[%c0_13, %c0_14] : memref<8x128xf32, #tpu.memory_space<vmem>>, vector<8x128xf32>
    %30 = vector.broadcast %19 : vector<8x1xf32> to vector<8x128xf32>
    %31 = arith.mulf %30, %29 : vector<8x128xf32>
    %cst_15 = arith.constant dense<0.000000e+00> : vector<8x128xf32>
    %32 = tpu.matmul %22, %3, %cst_15 {dimension_numbers = #tpu.dot_dimension_numbers<[1], [0], [0], [1], [0, 0, 1, 1], [], []>} : vector<8x128xf32>, vector<128x128xf32>, vector<8x128xf32> -> vector<8x128xf32>
    %33 = arith.addf %31, %32 : vector<8x128xf32>
    %c0_16 = arith.constant 0 : index
    %c0_17 = arith.constant 0 : index
    %34 = vector.load %arg10[%c0_16, %c0_17] : memref<8x128xf32, #tpu.memory_space<vmem>>, vector<8x128xf32>
    tpu.vector_store %arg10[%c0_16, %c0_17], %33 {strides = array<i32>} : memref<8x128xf32, #tpu.memory_space<vmem>>, vector<8x128xf32>,
    %c0_18 = arith.constant 0 : index
    %c0_19 = arith.constant 0 : index
    %35 = vector.load %arg8[%c0_18, %c0_19] : memref<8x1xf32, #tpu.memory_space<vmem>>, vector<8x1xf32>
    tpu.vector_store %arg8[%c0_18, %c0_19], %17 {strides = array<i32>} : memref<8x1xf32, #tpu.memory_space<vmem>>, vector<8x1xf32>,
    %c0_i32_20 = arith.constant 0 : i32
    %36 = arith.cmpi eq, %arg1, %c0_i32_20 : i32
    %37 = arith.extui %36 : i1 to i32
    %c0_i32_21 = arith.constant 0 : i32
    %38 = arith.cmpi ne, %37, %c0_i32_21 : i32
    scf.if %38 {
      %c0_22 = arith.constant 0 : index
      %c0_23 = arith.constant 0 : index
      %39 = vector.load %arg10[%c0_22, %c0_23] : memref<8x128xf32, #tpu.memory_space<vmem>>, vector<8x128xf32>
      %c0_24 = arith.constant 0 : index
      %c0_25 = arith.constant 0 : index
      %40 = vector.load %arg9[%c0_24, %c0_25] : memref<8x1xf32, #tpu.memory_space<vmem>>, vector<8x1xf32>
      %41 = tpu.reciprocal %40 : vector<8x1xf32> -> vector<8x1xf32>
      %42 = vector.broadcast %41 : vector<8x1xf32> to vector<8x128xf32>
      %43 = arith.mulf %39, %42 : vector<8x128xf32>
      %c0_26 = arith.constant 0 : index
      %c0_27 = arith.constant 0 : index
      %44 = vector.load %arg6[%c0_26, %c0_27] : memref<8x128xf32, #tpu.memory_space<vmem>>, vector<8x128xf32>
      tpu.vector_store %arg6[%c0_26, %c0_27], %43 {strides = array<i32>} : memref<8x128xf32, #tpu.memory_space<vmem>>, vector<8x128xf32>,
    } else {
    }
    return
  }
  func.func @transform_0(%arg0: i32, %arg1: i32) -> (i32, i32) {
    %c0_i32 = arith.constant 0 : i32
    %c0_i32_0 = arith.constant 0 : i32
    return %arg0, %c0_i32 : i32, i32
  }
  func.func @transform_1(%arg0: i32, %arg1: i32) -> (i32, i32) {
    %c0_i32 = arith.constant 0 : i32
    %c0_i32_0 = arith.constant 0 : i32
    %c0_i32_1 = arith.constant 0 : i32
    return %c0_i32, %c0_i32_0 : i32, i32
  }
  func.func @transform_2(%arg0: i32, %arg1: i32) -> (i32, i32) {
    %c0_i32 = arith.constant 0 : i32
    %c0_i32_0 = arith.constant 0 : i32
    %c0_i32_1 = arith.constant 0 : i32
    return %c0_i32, %c0_i32_0 : i32, i32
  }
  func.func @transform_3(%arg0: i32, %arg1: i32) -> (i32, i32) {
    %c0_i32 = arith.constant 0 : i32
    %c0_i32_0 = arith.constant 0 : i32
    return %arg1, %c0_i32 : i32, i32
  }
  func.func @transform_4(%arg0: i32, %arg1: i32) -> (i32, i32) {
    %c0_i32 = arith.constant 0 : i32
    %c0_i32_0 = arith.constant 0 : i32
    return %arg0, %c0_i32 : i32, i32
  }
}

</mosaic_0001>

<bundles_post_ra>
// kernel: tpu_custom_call.1
= control target key start
LH: loop header
LB: loop body
LE: loop exit
PB: predicated region body
PF: predicated region fallthrough
CT: control target
= control target key end

     0   :  { %9 = vsyncpa [#allocation7], 0  ;;  %s755_s0 = inlined_call_operand.hbm [shape: f32[8,128], index: 0, kind: input, shape index: {}]   ;;  %s756_s1 = inlined_call_operand.hbm [shape: f32[128,128], index: 1, kind: input, shape index: {}]   ;;  %s757_s2 = inlined_call_operand.vmem [shape: f32[1,128], index: 2, kind: input, shape index: {}]   ;;  %s758_s3 = inlined_call_operand.hbm [shape: f32[128,128], index: 3, kind: input, shape index: {}]   ;;  %s759_s4 = inlined_call_operand.hbm [shape: f32[8,128], index: 4, kind: output, shape index: {}]  }
   0x1   :  { %10 = vsyncpa [#allocation10], 0 }
   0x2   :  { %11 = vsyncpa [#allocation8], 0  ;;  %s646_s15 = smov [#allocation9]  }
   0x3   :  { %s27_s16 = sshll.u32 %s646_s15, 4  ;;  %s28_s16 = int_to_ptr.vmem [resolvable:$true] %s27_s16 }
   0x4   :  { %s568_s17 = scalar_lea.vmem %s28_s16, 2048  ;;  %p573_p1 = scmp.lt.s32.totalorder %s28_s16, %s28_s16 }
   0x5   :  { %p569_p0 = scmp.ne.s32.totalorder %s28_s16, %s568_s17  ;;  %p574_p2 = scmp.lt.s32.totalorder %s568_s17, %s568_s17 }
   0x7   :  { %p575_p3 = por %p574_p2, %p573_p1 }
   0x9   :  { %p576_p4 = pnand %p575_p3, %p569_p0 }
   0xb   :  { %579 = shalt.err (!%p576_p4)
}
   0xc   :  { %s647_s18 = smov 128   ;;  %s648_s19 = smov 8  }
   0xd   :  { %33 = dma.hbm_to_vmem [thread:$0]  %s756_s1, 2048, %s28_s16, [#allocation10], %s647_s18, %s647_s18, %s648_s19  }
   0xe   :  { %s649_s22 = smov [#allocation6]   ;;  %s650_s24 = smov [#allocation11]  }
   0xf   :  { %s18_s23 = sshll.u32 %s649_s22, 4  ;;  %s41_s25 = sshll.u32 %s650_s24, 4  ;;  %s19_s23 = int_to_ptr.vmem [resolvable:$true] %s18_s23  ;;  %s42_s25 = int_to_ptr.vmem [resolvable:$true] %s41_s25 }
  0x10   :  { %s588_s26 = scalar_lea.vmem %s19_s23, 128  ;;  %p593_p6 = scmp.lt.s32.totalorder %s19_s23, %s19_s23 }
  0x11   :  { %p589_p5 = scmp.ne.s32.totalorder %s19_s23, %s588_s26  ;;  %p594_p7 = scmp.lt.s32.totalorder %s588_s26, %s588_s26 }
  0x13   :  { %p595_p8 = por %p594_p7, %p593_p6 }
  0x15   :  { %p596_p9 = pnand %p595_p8, %p589_p5 }
  0x17   :  { %599 = shalt.err (!%p596_p9)
}
  0x18   :  { %21 = dma.hbm_to_vmem [thread:$0]  %s755_s0, 128, %s19_s23, [#allocation7]  }
  0x19   :  { %s608_s29 = scalar_lea.vmem %s42_s25, 2048  ;;  %p613_p11 = scmp.lt.s32.totalorder %s42_s25, %s42_s25 }
  0x1a   :  { %p609_p10 = scmp.ne.s32.totalorder %s42_s25, %s608_s29  ;;  %p614_p12 = scmp.lt.s32.totalorder %s608_s29, %s608_s29 }
  0x1c   :  { %p615_p13 = por %p614_p12, %p613_p11 }
  0x1e   :  { %p616_p0 = pnand %p615_p13, %p609_p10 }
  0x20   :  { %619 = shalt.err (!%p616_p0)
}
  0x21   :  { %47 = dma.hbm_to_vmem [thread:$0]  %s758_s3, 2048, %s42_s25, [#allocation10], %s647_s18, %s647_s18, %s648_s19  }
  0x22   :  { %640 = dma.done.wait [#allocation7], 128  }
  0x23   :  { %641 = vsyncadd [#allocation7], 4294967168 }
  0x24   :  { %642 = dma.done.wait [#allocation10], 4096  }
  0x25   :  { %643 = vsyncadd [#allocation10], 4294963200  ;;  %v651_v0 = vmov 0.0   ;;  %vm652_vm0 = vmmov 0   ;;  %v77_v1 = vld [vmem:[#allocation9 + $0x78] sm:$0xff]  ;;  %v76_v2 = vld [vmem:[#allocation9 + $0x70] sm:$0xff]  ;;  %v248_v39 = vlaneseq }
  0x26   :  { %437 = vmatprep.subr.mxu0 %v651_v0  ;;  %469 = vmatprep.mubr.msk.f32.mxu0 %vm652_vm0, %v651_v0  ;;  %v75_v3 = vld [vmem:[#allocation9 + $0x68] sm:$0xff]  ;;  %v74_v4 = vld [vmem:[#allocation9 + $0x60] sm:$0xff]  ;;  %v175_v5 = vld [vmem:[#allocation11 + $0x78] sm:$0xff]  ;;  %vm156_vm1 = vcmask 7168   ;;  %v653_v38 = vmov -inf   ;;  %v654_v44 = vmov 0  }
  0x27   :  { %472 = vmatprep.subr.mxu1 %v651_v0  ;;  %504 = vmatprep.mubr.msk.f32.mxu1 %vm652_vm0, %v651_v0  ;;  %v73_v6 = vld [vmem:[#allocation9 + $0x58] sm:$0xff]  ;;  %v174_v7 = vld [vmem:[#allocation11 + $0x70] sm:$0xff]  ;;  %v71_v9 = vld [vmem:[#allocation9 + $0x48] sm:$0xff]  ;;  %157 = vst.msk [vmem:[#allocation3] sm:$0xff] %vm156_vm1, %v653_v38  ;;  %v249_v40 = vand.u32 127, %v248_v39 }
  0x28   :  { %438 = vmatpush3.msra.mxu0 %v77_v1  ;;  %473 = vmatpush3.xpose.msra.mxu1 %v175_v5  ;;  %v72_v8 = vld [vmem:[#allocation9 + $0x50] sm:$0xff]  ;;  %v173_v10 = vld [vmem:[#allocation11 + $0x68] sm:$0xff]  ;;  %v70_v11 = vld [vmem:[#allocation9 + $0x40] sm:$0xff]  ;;  %158 = vst.msk [vmem:[#allocation4] sm:$0xff] %vm156_vm1, %v651_v0 }
  0x29   :  { %439 = vmatprep.subr.mxu0 %v651_v0  ;;  %474 = vmatprep.subr.mxu1 %v651_v0  ;;  %v69_v12 = vld [vmem:[#allocation9 + $0x38] sm:$0xff]  ;;  %v172_v13 = vld [vmem:[#allocation11 + $0x60] sm:$0xff]  ;;  %v68_v14 = vld [vmem:[#allocation9 + $0x30] sm:$0xff]  ;;  %vm252_vm2 = vcmp.lt.s32.totalorder %v249_v40, 16 }
  0x2a   :  { %440 = vmatpush3.msra.mxu0 %v76_v2  ;;  %v67_v15 = vld [vmem:[#allocation9 + $0x28] sm:$0xff]  ;;  %v171_v16 = vld [vmem:[#allocation11 + $0x58] sm:$0xff]  ;;  %v66_v17 = vld [vmem:[#allocation9 + $0x20] sm:$0xff]  ;;  %552 = vset.pattern.permute.xlu0 %v654_v44 }
  0x2b   :  { %441 = vmatprep.subr.mxu0 %v651_v0  ;;  %v65_v18 = vld [vmem:[#allocation9 + $0x18] sm:$0xff]  ;;  %v170_v19 = vld [vmem:[#allocation11 + $0x50] sm:$0xff]  ;;  %v63_v21 = vld [vmem:[#allocation9 + $0x8] sm:$0xff]  ;;  %553 = vset.pattern.permute.xlu1 %v654_v44 }
  0x2c   :  { %442 = vmatpush3.msra.mxu0 %v75_v3  ;;  %475 = vmatpush3.xpose.msra.mxu1 %v174_v7  ;;  %v64_v20 = vld [vmem:[#allocation9 + $0x10] sm:$0xff]  ;;  %v169_v22 = vld [vmem:[#allocation11 + $0x48] sm:$0xff]  ;;  %v62_v23 = vld [vmem:[#allocation9] sm:$0xff] }
  0x2d   :  { %443 = vmatprep.subr.mxu0 %v651_v0  ;;  %476 = vmatprep.subr.mxu1 %v651_v0  ;;  %v61_v24 = vld [vmem:[#allocation6] sm:$0xff]  ;;  %v168_v25 = vld [vmem:[#allocation11 + $0x40] sm:$0xff]  ;;  %v166_v27 = vld [vmem:[#allocation11 + $0x30] sm:$0xff] }
  0x2e   :  { %444 = vmatpush3.msra.mxu0 %v74_v4  ;;  %v167_v26 = vld [vmem:[#allocation11 + $0x38] sm:$0xff]  ;;  %v165_v28 = vld [vmem:[#allocation11 + $0x28] sm:$0xff]  ;;  %v164_v29 = vld [vmem:[#allocation11 + $0x20] sm:$0xff] }
  0x2f   :  { %445 = vmatprep.subr.mxu0 %v651_v0  ;;  %v163_v30 = vld [vmem:[#allocation11 + $0x18] sm:$0xff]  ;;  %v162_v31 = vld [vmem:[#allocation11 + $0x10] sm:$0xff]  ;;  %v161_v32 = vld [vmem:[#allocation11 + $0x8] sm:$0xff] }
  0x30   :  { %446 = vmatpush3.msra.mxu0 %v73_v6  ;;  %477 = vmatpush3.xpose.msra.mxu1 %v173_v10  ;;  %v160_v33 = vld [vmem:[#allocation11] sm:$0xff]  ;;  %v385_v34 = vld [vmem:[%s757_s2] ss:$0 sm:$0xff]  ;;  %v269_v55 = vld [vmem:[#allocation4] sm:$0xff]  ;;  %s655_s2 = smov [#allocation12]  }
  0x31   :  { %447 = vmatprep.subr.mxu0 %v651_v0  ;;  %478 = vmatprep.subr.mxu1 %v651_v0  ;;  %v254_v45 = vld [vmem:[#allocation3] sm:$0xff]  ;;  %s375_s5 = sshll.u32 %s655_s2, 4  ;;  %s376_s5 = int_to_ptr.vmem [resolvable:$true] %s375_s5 }
  0x32   :  { %448 = vmatpush3.msra.mxu0 %v72_v8  ;;  %s620_s6 = scalar_lea.vmem %s376_s5, 128  ;;  %p625_p2 = scmp.lt.s32.totalorder %s376_s5, %s376_s5 }
  0x33   :  { %449 = vmatprep.subr.mxu0 %v651_v0  ;;  %p621_p1 = scmp.ne.s32.totalorder %s376_s5, %s620_s6  ;;  %p626_p3 = scmp.lt.s32.totalorder %s620_s6, %s620_s6 }
  0x34   :  { %450 = vmatpush3.msra.mxu0 %v71_v9  ;;  %479 = vmatpush3.xpose.msra.mxu1 %v172_v13 }
  0x35   :  { %451 = vmatprep.subr.mxu0 %v651_v0  ;;  %480 = vmatprep.subr.mxu1 %v651_v0  ;;  %p627_p4 = por %p626_p3, %p625_p2 }
  0x36   :  { %452 = vmatpush3.msra.mxu0 %v70_v11 }
  0x37   :  { %453 = vmatprep.subr.mxu0 %v651_v0  ;;  %p628_p5 = pnand %p627_p4, %p621_p1 }
  0x38   :  { %454 = vmatpush3.msra.mxu0 %v69_v12  ;;  %481 = vmatpush3.xpose.msra.mxu1 %v171_v16 }
  0x39   :  { %455 = vmatprep.subr.mxu0 %v651_v0  ;;  %482 = vmatprep.subr.mxu1 %v651_v0 }
  0x3a   :  { %456 = vmatpush3.msra.mxu0 %v68_v14 }
  0x3b   :  { %457 = vmatprep.subr.mxu0 %v651_v0 }
  0x3c   :  { %458 = vmatpush3.msra.mxu0 %v67_v15  ;;  %483 = vmatpush3.xpose.msra.mxu1 %v170_v19 }
  0x3d   :  { %459 = vmatprep.subr.mxu0 %v651_v0  ;;  %484 = vmatprep.subr.mxu1 %v651_v0 }
  0x3e   :  { %460 = vmatpush3.msra.mxu0 %v66_v17 }
  0x3f   :  { %461 = vmatprep.subr.mxu0 %v651_v0 }
  0x40   :  { %462 = vmatpush3.msra.mxu0 %v65_v18  ;;  %485 = vmatpush3.xpose.msra.mxu1 %v169_v22 }
  0x41   :  { %463 = vmatprep.subr.mxu0 %v651_v0  ;;  %486 = vmatprep.subr.mxu1 %v651_v0 }
  0x42   :  { %464 = vmatpush3.msra.mxu0 %v64_v20 }
  0x43   :  { %465 = vmatprep.subr.mxu0 %v651_v0 }
  0x44   :  { %466 = vmatpush3.msra.mxu0 %v63_v21  ;;  %487 = vmatpush3.xpose.msra.mxu1 %v168_v25 }
  0x45   :  { %467 = vmatprep.subr.mxu0 %v651_v0  ;;  %488 = vmatprep.subr.mxu1 %v651_v0 }
  0x46   :  { %468 = vmatpush3.msra.mxu0 %v62_v23 }
  0x47   :  { %470 = vmatmul.mubr.f32.vlgmr.msra.gmra.mxu0 %v61_v24  ;;  %507 = vmatprep.subr.mxu0 %v651_v0 }
  0x48   :  { %508 = vmatpush3.msra.mxu0 %v175_v5  ;;  %539 = vmatprep.mubr.msk.f32.mxu0 %vm652_vm0, %v651_v0 }
  0x49   :  { %509 = vmatprep.subr.mxu0 %v651_v0  ;;  %489 = vmatpush3.xpose.msra.mxu1 %v167_v26 }
  0x4a   :  { %510 = vmatpush3.msra.mxu0 %v174_v7  ;;  %490 = vmatprep.subr.mxu1 %v651_v0 }
  0x4b   :  { %511 = vmatprep.subr.mxu0 %v651_v0 }
  0x4c   :  { %512 = vmatpush3.msra.mxu0 %v173_v10 }
  0x4d   :  { %513 = vmatprep.subr.mxu0 %v651_v0  ;;  %491 = vmatpush3.xpose.msra.mxu1 %v166_v27 }
  0x4e   :  { %514 = vmatpush3.msra.mxu0 %v172_v13  ;;  %492 = vmatprep.subr.mxu1 %v651_v0 }
  0x4f   :  { %515 = vmatprep.subr.mxu0 %v651_v0 }
  0x50   :  { %516 = vmatpush3.msra.mxu0 %v171_v16 }
  0x51   :  { %517 = vmatprep.subr.mxu0 %v651_v0  ;;  %493 = vmatpush3.xpose.msra.mxu1 %v165_v28 }
  0x52   :  { %518 = vmatpush3.msra.mxu0 %v170_v19  ;;  %494 = vmatprep.subr.mxu1 %v651_v0 }
  0x53   :  { %519 = vmatprep.subr.mxu0 %v651_v0 }
  0x54   :  { %520 = vmatpush3.msra.mxu0 %v169_v22 }
  0x55   :  { %521 = vmatprep.subr.mxu0 %v651_v0  ;;  %495 = vmatpush3.xpose.msra.mxu1 %v164_v29 }
  0x56   :  { %522 = vmatpush3.msra.mxu0 %v168_v25  ;;  %496 = vmatprep.subr.mxu1 %v651_v0 }
  0x57   :  { %523 = vmatprep.subr.mxu0 %v651_v0 }
  0x58   :  { %524 = vmatpush3.msra.mxu0 %v167_v26 }
  0x59   :  { %525 = vmatprep.subr.mxu0 %v651_v0  ;;  %497 = vmatpush3.xpose.msra.mxu1 %v163_v30 }
  0x5a   :  { %526 = vmatpush3.msra.mxu0 %v166_v27  ;;  %498 = vmatprep.subr.mxu1 %v651_v0 }
  0x5b   :  { %527 = vmatprep.subr.mxu0 %v651_v0 }
  0x5c   :  { %528 = vmatpush3.msra.mxu0 %v165_v28 }
  0x5d   :  { %529 = vmatprep.subr.mxu0 %v651_v0  ;;  %499 = vmatpush3.xpose.msra.mxu1 %v162_v31 }
  0x5e   :  { %530 = vmatpush3.msra.mxu0 %v164_v29  ;;  %500 = vmatprep.subr.mxu1 %v651_v0 }
  0x5f   :  { %531 = vmatprep.subr.mxu0 %v651_v0 }
  0x60   :  { %532 = vmatpush3.msra.mxu0 %v163_v30 }
  0x61   :  { %533 = vmatprep.subr.mxu0 %v651_v0  ;;  %501 = vmatpush3.xpose.msra.mxu1 %v161_v32 }
  0x62   :  { %534 = vmatpush3.msra.mxu0 %v162_v31  ;;  %502 = vmatprep.subr.mxu1 %v651_v0 }
  0x63   :  { %535 = vmatprep.subr.mxu0 %v651_v0 }
  0x64   :  { %536 = vmatpush3.msra.mxu0 %v161_v32 }
  0x65   :  { %537 = vmatprep.subr.mxu0 %v651_v0  ;;  %503 = vmatpush3.xpose.msra.mxu1 %v160_v33 }
  0x66   :  { %538 = vmatpush3.msra.mxu0 %v160_v33 }
 0x107   :  { %v151_v35 = vpop.f32.mrf.mxu0 }
 0x108   :  { %v152_v36 = vadd.f32 %v385_v34, %v151_v35 }
 0x109   :  { %v471_v37 = vpop.f32.mrf.mxu0 }
 0x10a   :  { %505 = vmatmul.mubr.f32.vlgmr.msra.gmra.mxu1 %v152_v36 }
 0x1ca   :  { %v243_v41 = vpop.f32.mrf.mxu1 }
 0x1cb   :  { %v253_v42 = vsel %vm252_vm2, %v243_v41, -1e+30 }
 0x1cc   :  { %255 = vmax.xlane.f32.xlu0 %v253_v42  ;;  %v506_v43 = vpop.f32.mrf.mxu1 }
 0x255   :  { %v256_v46 = vpop.xlane.xlu0 %255 }
 0x256   :  { %v257_v47 = vmax.f32 %v254_v45, %v256_v46 }
 0x258   :  { %v258_v48 = vsub.f32 %v254_v45, %v257_v47  ;;  %355 = vst.msk [vmem:[#allocation3] sm:$0xff] %vm156_vm1, %v257_v47  ;;  %263 = vperm.xlu0 %552, %v257_v47  }
 0x25a   :  { %v259_v53 = vmul.f32 1.442695, %v258_v48 }
 0x2d3   :  { %v264_v49 = vpop.permute.xlu0 %263 }
 0x2d4   :  { %v266_v50 = vsub.f32 %v253_v42, %v264_v49 }
 0x2d6   :  { %v267_v51 = vmul.f32 1.442695, %v266_v50 }
 0x2d8   :  { %554 = vpow2.f32 %v267_v51 }
 0x2d9   :  { %556 = vpow2.f32 %v259_v53 }
 0x2e5   :  { %v555_v52 = vpop.eup %554 }
 0x2e6   :  { %271 = vadd.xlane.f32.xlu1 %v555_v52  ;;  %540 = vmatmul.mubr.f32.vlgmr.msra.gmra.mxu0 %v555_v52  ;;  %v557_v54 = vpop.eup %556 }
 0x2e7   :  { %v270_v56 = vmul.f32 %v557_v54, %v269_v55 }
 0x2f7   :  { %279 = vperm.xlu1 %553, %v557_v54  }
 0x36f   :  { %v272_v57 = vpop.xlane.xlu1 %271 }
 0x370   :  { %v273_v58 = vadd.f32 %v272_v57, %v270_v56 }
 0x372   :  { %275 = vst.msk [vmem:[#allocation4] sm:$0xff] %vm156_vm1, %v273_v58 }
 0x373   :  { %v280_v63 = vpop.permute.xlu1 %279 }
 0x374   :  { %v282_v0 = vmul.f32 0.0, %v280_v63 }
 0x379   :  { %v360_v59 = vld [vmem:[#allocation4] sm:$0xff] }
 0x37a   :  { %558 = vrcp.f32 %v360_v59 }
 0x387   :  { %v559_v60 = vpop.eup %558 }
 0x388   :  { %364 = vperm.xlu1 %553, %v559_v60  }
 0x3a6   :  { %v349_v61 = vpop.f32.mrf.mxu0 }
 0x3a7   :  { %v353_v1 = vadd.f32 %v349_v61, %v282_v0 }
 0x3a8   :  { %v541_v62 = vpop.f32.mrf.mxu0 }
 0x403   :  { %v365_v2 = vpop.permute.xlu1 %364 }
 0x404   :  { %v367_v3 = vmul.f32 %v365_v2, %v353_v1 }
 0x406   :  { %368 = vst [vmem:[#allocation12] sm:$0xff] %v367_v3 }
 0x407   :  { %631 = shalt.err (!%p628_p5)
}
 0x408   :  { %378 = dma.vmem_to_hbm [thread:$0]  %s376_s5, 128, %s759_s4, [#allocation8]  }
 0x409   :  { %644 = dma.done.wait [#allocation8], 128  }
 0x40a   :  { %645 = vsyncadd [#allocation8], 4294967168 }
 0x40b   :  { %382 = vsyncpa [#allocation7], 1 }
 0x40c   :  { %383 = vsyncpa [#allocation10], 1 }
 0x40d   :  { %384 = vsyncpa [#allocation8], 1 }

</bundles_post_ra>
